<compile_context>
chip_gen: v7x
topology: tpu7x:2x2x1
jax: 0.10.0
libtpu: 0.0.40
codegen_flags: <defaults>
</compile_context>

<pallas_src>
import functools

import jax
import jax.numpy as jnp
import numpy as np
from jax.experimental import pallas as pl
from jax.experimental.pallas import tpu as pltpu

# ----------------------------- configuration --------------------------------
EMBEDDING_DIM = 16
EMB_COLS = [1, 2, 3, 4, 5, 7, 8, 9, 10]          # columns used by forward()
VOCAB_RANGES = [7, 5, 11, 9, 13, 6, 10, 8, 12]   # plat_form ... rvcr_city_name
NUM_COLS = 11                                    # x has (at least) 11 columns
IN_DIM = 9 * EMBEDDING_DIM                       # 144
H1, H2, H3, OUT = 512, 256, 128, 1
BN_EPS = 1e-5
MAX_BATCH_TILE = 512                             # rows per batch tile (VMEM-safe on v7x)


def _round_up(x, m):
    return ((x + m - 1) // m) * m


# ------------------------------- Pallas kernel ------------------------------
def _mlp_head_kernel(x_ref,
                     w1_ref, b1_ref,
                     w2_ref, b2_ref,
                     w3_ref, b3_ref,
                     w4_ref, b4_ref,
                     out_ref):
    """One grid step == (one head, one batch tile). BN/bias already folded into W,b."""
    x = x_ref[...]                                                     # [BT, 144] bf16

    h = jnp.dot(x, w1_ref[...], preferred_element_type=jnp.float32) + b1_ref[...]
    h = jnp.maximum(h, 0.0)                                            # [BT, 512]

    h = jnp.dot(h.astype(jnp.bfloat16), w2_ref[...],
                preferred_element_type=jnp.float32) + b2_ref[...]
    h = jnp.maximum(h, 0.0)                                            # [BT, 256]

    h = jnp.dot(h.astype(jnp.bfloat16), w3_ref[...],
                preferred_element_type=jnp.float32) + b3_ref[...]
    h = jnp.maximum(h, 0.0)                                            # [BT, 128]

    # Final Linear(128, 1): lane reduction (avoids an N=1 MXU matmul), kept in f32.
    out_ref[...] = (jnp.sum(h * w4_ref[...].T, axis=-1, keepdims=True)
                    + b4_ref[...])                                     # [BT, 1]


def mlp_heads(feat_bf16, heads):
    """feat_bf16: [B, 144] bf16; heads: dict of per-head-stacked folded params."""
    B = feat_bf16.shape[0]
    BT = min(_round_up(B, 8), MAX_BATCH_TILE)
    B_pad = _round_up(B, BT)
    if B_pad != B:
        feat_bf16 = jnp.pad(feat_bf16, ((0, B_pad - B), (0, 0)))
    nb = B_pad // BT

    args = [feat_bf16]
    in_specs = [pl.BlockSpec((BT, IN_DIM), lambda h, b: (b, 0))]
    for name in ("w1", "b1", "w2", "b2", "w3", "b3", "w4", "b4"):
        arr = heads[name]
        args.append(arr)
        nd = arr.ndim - 1  # per-head param rank
        in_specs.append(
            pl.BlockSpec((None,) + arr.shape[1:],
                         lambda h, b, nd=nd: (h,) + (0,) * nd))

    out = pl.pallas_call(
        _mlp_head_kernel,
        out_shape=jax.ShapeDtypeStruct((2, B_pad, 1), jnp.float32),
        grid=(2, nb),                               # head axis OUTER: weights DMA'd once/head
        in_specs=in_specs,
        out_specs=pl.BlockSpec((None, BT, 1), lambda h, b: (h, b, 0)),
        compiler_params=pltpu.CompilerParams(
            dimension_semantics=("parallel", "parallel")),
    )(*args)
    return out[0, :B], out[1, :B]


# --------------------------- parameter construction --------------------------
def _fold_and_stack(raw_heads):
    """Fold eval-mode BN + bias into each Linear; cast matmul weights to bf16; stack heads."""
    def fold(p):
        f = {}
        for li in (1, 2, 3):
            scale = p[f"g{li}"] / jnp.sqrt(p[f"v{li}"] + BN_EPS)       # (1, N)
            shift = p[f"be{li}"] - p[f"m{li}"] * scale
            f[f"w{li}"] = (p[f"w{li}"] * scale).astype(jnp.bfloat16)   # column scale
            f[f"b{li}"] = p[f"b{li}"] * scale + shift                  # f32
        f["w4"] = p["w4"]                                              # (128, 1) f32 (tiny)
        f["b4"] = p["b4"]
        return f

    f0, f1 = fold(raw_heads[0]), fold(raw_heads[1])
    return {k: jnp.stack([f0[k], f1[k]], axis=0) for k in f0}


def init_params(key):
    keys = iter(jax.random.split(key, 64))
    params = {}

    # Fused embedding table: [sum(vocab), 16] with per-column index offsets.
    tables = [jax.random.normal(next(keys), (v, EMBEDDING_DIM), jnp.float32)
              for v in VOCAB_RANGES]
    params["emb_table"] = jnp.concatenate(tables, axis=0)
    params["emb_offsets"] = jnp.asarray(
        np.cumsum([0] + VOCAB_RANGES[:-1]), jnp.int32)

    def make_head():
        def linear(fan_in, fan_out):
            bound = 1.0 / np.sqrt(fan_in)
            w = jax.random.uniform(next(keys), (fan_in, fan_out), jnp.float32,
                                   -bound, bound)
            b = jax.random.uniform(next(keys), (1, fan_out), jnp.float32,
                                   -bound, bound)
            return w, b

        def bn(n):
            g = jax.random.uniform(next(keys), (1, n), jnp.float32, 0.5, 1.5)
            be = 0.1 * jax.random.normal(next(keys), (1, n), jnp.float32)
            m = 0.1 * jax.random.normal(next(keys), (1, n), jnp.float32)
            v = jax.random.uniform(next(keys), (1, n), jnp.float32, 0.5, 1.5)
            return g, be, m, v

        hp = {}
        hp["w1"], hp["b1"] = linear(IN_DIM, H1)
        hp["g1"], hp["be1"], hp["m1"], hp["v1"] = bn(H1)
        hp["w2"], hp["b2"] = linear(H1, H2)
        hp["g2"], hp["be2"], hp["m2"], hp["v2"] = bn(H2)
        hp["w3"], hp["b3"] = linear(H2, H3)
        hp["g3"], hp["be3"], hp["m3"], hp["v3"] = bn(H3)
        hp["w4"], hp["b4"] = linear(H3, OUT)
        return hp

    params["raw_heads"] = [make_head(), make_head()]
    params["kernel_heads"] = _fold_and_stack(params["raw_heads"])
    return params


# ------------------------------ forward wrappers -----------------------------
def _gather_feat(x_idx, params):
    idx = x_idx[:, jnp.asarray(EMB_COLS)] + params["emb_offsets"][None, :]   # [B, 9]
    feat = jnp.take(params["emb_table"], idx.reshape(-1), axis=0)
    return feat.reshape(x_idx.shape[0], IN_DIM)                              # [B, 144] f32


@jax.jit
def network_forward(x_idx, params):
    feat = _gather_feat(x_idx, params).astype(jnp.bfloat16)
    return mlp_heads(feat, params["kernel_heads"])


def network_forward_ref_matched(x_idx, params):
    """Pure-JAX reference using the same folded-bf16 math as the kernel (tight check)."""
    feat = _gather_feat(x_idx, params).astype(jnp.bfloat16)
    outs = []
    for h in range(2):
        p = {k: params["kernel_heads"][k][h] for k in params["kernel_heads"]}
        a = jnp.dot(feat, p["w1"], preferred_element_type=jnp.float32) + p["b1"]
        a = jnp.maximum(a, 0.0)
        a = jnp.dot(a.astype(jnp.bfloat16), p["w2"],
                    preferred_element_type=jnp.float32) + p["b2"]
        a = jnp.maximum(a, 0.0)
        a = jnp.dot(a.astype(jnp.bfloat16), p["w3"],
                    preferred_element_type=jnp.float32) + p["b3"]
        a = jnp.maximum(a, 0.0)
        outs.append(jnp.dot(a, p["w4"], preferred_element_type=jnp.float32) + p["b4"])
    return outs[0], outs[1]


def network_forward_ref_f32(x_idx, params):
    """Full-precision, unfolded (explicit BN) reference (loose sanity check)."""
    feat = _gather_feat(x_idx, params)
    outs = []
    for h in range(2):
        p = params["raw_heads"][h]
        a = feat
        for li, _ in ((1, H1), (2, H2), (3, H3)):
            a = a @ p[f"w{li}"] + p[f"b{li}"]
            a = (a - p[f"m{li}"]) / jnp.sqrt(p[f"v{li}"] + BN_EPS) \
                * p[f"g{li}"] + p[f"be{li}"]
            a = jnp.maximum(a, 0.0)
        outs.append(a @ p["w4"] + p["b4"])
    return outs[0], outs[1]


# ----------------------------------- main ------------------------------------
if __name__ == "__main__":
    key = jax.random.PRNGKey(0)
    k_params, k_x = jax.random.split(key)

    params = init_params(k_params)

    B = 8
    # Build an integer feature table [B, NUM_COLS]; only the embedding columns matter.
    cols = []
    xkeys = jax.random.split(k_x, NUM_COLS)
    for c in range(NUM_COLS):
        if c in EMB_COLS:
            vocab = VOCAB_RANGES[EMB_COLS.index(c)]
            cols.append(jax.random.randint(xkeys[c], (B,), 0, vocab, jnp.int32))
        else:
            cols.append(jnp.zeros((B,), jnp.int32))
    x = jnp.stack(cols, axis=1)                                # [B, 11] int32

    out1, out2 = network_forward(x, params)
    jax.block_until_ready((out1, out2))

    # Tight check: same folded/bf16 math in plain JAX.
    m1, m2 = network_forward_ref_matched(x, params)
    np.testing.assert_allclose(np.asarray(out1), np.asarray(m1), rtol=1e-3, atol=1e-3)
    np.testing.assert_allclose(np.asarray(out2), np.asarray(m2), rtol=1e-3, atol=1e-3)

    # Loose check: full-f32 unfolded (explicit BN) semantics of the PyTorch module.
    r1, r2 = network_forward_ref_f32(x, params)
    np.testing.assert_allclose(np.asarray(out1), np.asarray(r1), rtol=5e-2, atol=5e-2)
    np.testing.assert_allclose(np.asarray(out2), np.asarray(r2), rtol=5e-2, atol=5e-2)

    assert out1.shape == (B, 1) and out2.shape == (B, 1)

    print("KERNEL_OK")
</pallas_src>

<mosaic_0001>
module attributes {stable_mosaic.version = 11 : i64} {
  func.func @_mlp_head_kernel(%arg0: i32, %arg1: i32, %arg2: memref<8x144xbf16, #tpu.memory_space<vmem>>, %arg3: memref<1x144x512xbf16, #tpu.memory_space<vmem>>, %arg4: memref<1x1x512xf32, #tpu.memory_space<vmem>>, %arg5: memref<1x512x256xbf16, #tpu.memory_space<vmem>>, %arg6: memref<1x1x256xf32, #tpu.memory_space<vmem>>, %arg7: memref<1x256x128xbf16, #tpu.memory_space<vmem>>, %arg8: memref<1x1x128xf32, #tpu.memory_space<vmem>>, %arg9: memref<1x128x1xf32, #tpu.memory_space<vmem>>, %arg10: memref<1x1x1xf32, #tpu.memory_space<vmem>>, %arg11: memref<1x8x1xf32, #tpu.memory_space<vmem>>) attributes {dimension_semantics = [#tpu.dimension_semantics<parallel>, #tpu.dimension_semantics<parallel>], iteration_bounds = array<i64: 2, 1>, scalar_prefetch = 0 : i64, scratch_operands = 0 : i64, tpu.core_type = #tpu.core_type<tc>, window_params = [{transform_indices = @transform_0, window_bounds = array<i64: 8, 144>}, {transform_indices = @transform_1, window_bounds = array<i64: 1, 144, 512>}, {transform_indices = @transform_2, window_bounds = array<i64: 1, 1, 512>}, {transform_indices = @transform_3, window_bounds = array<i64: 1, 512, 256>}, {transform_indices = @transform_4, window_bounds = array<i64: 1, 1, 256>}, {transform_indices = @transform_5, window_bounds = array<i64: 1, 256, 128>}, {transform_indices = @transform_6, window_bounds = array<i64: 1, 1, 128>}, {transform_indices = @transform_7, window_bounds = array<i64: 1, 128, 1>}, {transform_indices = @transform_8, window_bounds = array<i64: 1, 1, 1>}, {transform_indices = @transform_9, window_bounds = array<i64: 1, 8, 1>}]} {
    %c0 = arith.constant 0 : index
    %c0_0 = arith.constant 0 : index
    %0 = vector.load %arg2[%c0, %c0_0] : memref<8x144xbf16, #tpu.memory_space<vmem>>, vector<8x144xbf16>
    %c0_1 = arith.constant 0 : index
    %c0_2 = arith.constant 0 : index
    %c0_3 = arith.constant 0 : index
    %1 = vector.load %arg3[%c0_1, %c0_2, %c0_3] : memref<1x144x512xbf16, #tpu.memory_space<vmem>>, vector<1x144x512xbf16>
    %2 = vector.shape_cast %1 : vector<1x144x512xbf16> to vector<144x512xbf16>
    %cst = arith.constant dense<0.000000e+00> : vector<8x512xf32>
    %3 = tpu.matmul %0, %2, %cst {dimension_numbers = #tpu.dot_dimension_numbers<[1], [0], [0], [1], [0, 0, 1, 1], [], []>} : vector<8x144xbf16>, vector<144x512xbf16>, vector<8x512xf32> -> vector<8x512xf32>
    %c0_4 = arith.constant 0 : index
    %c0_5 = arith.constant 0 : index
    %c0_6 = arith.constant 0 : index
    %4 = vector.load %arg4[%c0_4, %c0_5, %c0_6] : memref<1x1x512xf32, #tpu.memory_space<vmem>>, vector<1x1x512xf32>
    %5 = vector.shape_cast %4 : vector<1x1x512xf32> to vector<1x512xf32>
    %6 = vector.broadcast %5 : vector<1x512xf32> to vector<8x512xf32>
    %7 = arith.addf %3, %6 : vector<8x512xf32>
    %cst_7 = arith.constant 0.000000e+00 : f32
    %8 = vector.broadcast %cst_7 : f32 to vector<8x512xf32>
    %9 = arith.maximumf %7, %8 : vector<8x512xf32>
    %10 = arith.truncf %9 : vector<8x512xf32> to vector<8x512xbf16>
    %c0_8 = arith.constant 0 : index
    %c0_9 = arith.constant 0 : index
    %c0_10 = arith.constant 0 : index
    %11 = vector.load %arg5[%c0_8, %c0_9, %c0_10] : memref<1x512x256xbf16, #tpu.memory_space<vmem>>, vector<1x512x256xbf16>
    %12 = vector.shape_cast %11 : vector<1x512x256xbf16> to vector<512x256xbf16>
    %cst_11 = arith.constant dense<0.000000e+00> : vector<8x256xf32>
    %13 = tpu.matmul %10, %12, %cst_11 {dimension_numbers = #tpu.dot_dimension_numbers<[1], [0], [0], [1], [0, 0, 1, 1], [], []>} : vector<8x512xbf16>, vector<512x256xbf16>, vector<8x256xf32> -> vector<8x256xf32>
    %c0_12 = arith.constant 0 : index
    %c0_13 = arith.constant 0 : index
    %c0_14 = arith.constant 0 : index
    %14 = vector.load %arg6[%c0_12, %c0_13, %c0_14] : memref<1x1x256xf32, #tpu.memory_space<vmem>>, vector<1x1x256xf32>
    %15 = vector.shape_cast %14 : vector<1x1x256xf32> to vector<1x256xf32>
    %16 = vector.broadcast %15 : vector<1x256xf32> to vector<8x256xf32>
    %17 = arith.addf %13, %16 : vector<8x256xf32>
    %cst_15 = arith.constant 0.000000e+00 : f32
    %18 = vector.broadcast %cst_15 : f32 to vector<8x256xf32>
    %19 = arith.maximumf %17, %18 : vector<8x256xf32>
    %20 = arith.truncf %19 : vector<8x256xf32> to vector<8x256xbf16>
    %c0_16 = arith.constant 0 : index
    %c0_17 = arith.constant 0 : index
    %c0_18 = arith.constant 0 : index
    %21 = vector.load %arg7[%c0_16, %c0_17, %c0_18] : memref<1x256x128xbf16, #tpu.memory_space<vmem>>, vector<1x256x128xbf16>
    %22 = vector.shape_cast %21 : vector<1x256x128xbf16> to vector<256x128xbf16>
    %cst_19 = arith.constant dense<0.000000e+00> : vector<8x128xf32>
    %23 = tpu.matmul %20, %22, %cst_19 {dimension_numbers = #tpu.dot_dimension_numbers<[1], [0], [0], [1], [0, 0, 1, 1], [], []>} : vector<8x256xbf16>, vector<256x128xbf16>, vector<8x128xf32> -> vector<8x128xf32>
    %c0_20 = arith.constant 0 : index
    %c0_21 = arith.constant 0 : index
    %c0_22 = arith.constant 0 : index
    %24 = vector.load %arg8[%c0_20, %c0_21, %c0_22] : memref<1x1x128xf32, #tpu.memory_space<vmem>>, vector<1x1x128xf32>
    %25 = vector.shape_cast %24 : vector<1x1x128xf32> to vector<1x128xf32>
    %26 = vector.broadcast %25 : vector<1x128xf32> to vector<8x128xf32>
    %27 = arith.addf %23, %26 : vector<8x128xf32>
    %cst_23 = arith.constant 0.000000e+00 : f32
    %28 = vector.broadcast %cst_23 : f32 to vector<8x128xf32>
    %29 = arith.maximumf %27, %28 : vector<8x128xf32>
    %c0_24 = arith.constant 0 : index
    %c0_25 = arith.constant 0 : index
    %c0_26 = arith.constant 0 : index
    %30 = vector.load %arg9[%c0_24, %c0_25, %c0_26] : memref<1x128x1xf32, #tpu.memory_space<vmem>>, vector<1x128x1xf32>
    %31 = vector.shape_cast %30 : vector<1x128x1xf32> to vector<128x1xf32>
    %32 = tpu.transpose %31, [1, 0] : vector<128x1xf32> -> vector<1x128xf32>
    %33 = vector.broadcast %32 : vector<1x128xf32> to vector<8x128xf32>
    %34 = arith.mulf %29, %33 : vector<8x128xf32>
    %cst_27 = arith.constant dense<0.000000e+00> : vector<8xf32>
    %35 = vector.multi_reduction <add>, %34, %cst_27 [1] : vector<8x128xf32> to vector<8xf32>
    %36 = vector.shape_cast %35 : vector<8xf32> to vector<8x1xf32>
    %c0_28 = arith.constant 0 : index
    %c0_29 = arith.constant 0 : index
    %c0_30 = arith.constant 0 : index
    %37 = vector.load %arg10[%c0_28, %c0_29, %c0_30] : memref<1x1x1xf32, #tpu.memory_space<vmem>>, vector<1x1x1xf32>
    %38 = vector.shape_cast %37 : vector<1x1x1xf32> to vector<1x1xf32>
    %39 = vector.broadcast %38 : vector<1x1xf32> to vector<8x1xf32>
    %40 = arith.addf %36, %39 : vector<8x1xf32>
    %c0_31 = arith.constant 0 : index
    %c0_32 = arith.constant 0 : index
    %c0_33 = arith.constant 0 : index
    %41 = vector.load %arg11[%c0_31, %c0_32, %c0_33] : memref<1x8x1xf32, #tpu.memory_space<vmem>>, vector<1x8x1xf32>
    %42 = vector.shape_cast %41 : vector<1x8x1xf32> to vector<8x1xf32>
    %43 = vector.shape_cast %40 : vector<8x1xf32> to vector<1x8x1xf32>
    tpu.vector_store %arg11[%c0_31, %c0_32, %c0_33], %43 {strides = array<i32>} : memref<1x8x1xf32, #tpu.memory_space<vmem>>, vector<1x8x1xf32>,
    return
  }
  func.func @transform_0(%arg0: i32, %arg1: i32) -> (i32, i32) {
    %c0_i32 = arith.constant 0 : i32
    %c0_i32_0 = arith.constant 0 : i32
    return %arg1, %c0_i32 : i32, i32
  }
  func.func @transform_1(%arg0: i32, %arg1: i32) -> (i32, i32, i32) {
    %c0_i32 = arith.constant 0 : i32
    %c0_i32_0 = arith.constant 0 : i32
    %c0_i32_1 = arith.constant 0 : i32
    return %arg0, %c0_i32, %c0_i32_0 : i32, i32, i32
  }
  func.func @transform_2(%arg0: i32, %arg1: i32) -> (i32, i32, i32) {
    %c0_i32 = arith.constant 0 : i32
    %c0_i32_0 = arith.constant 0 : i32
    %c0_i32_1 = arith.constant 0 : i32
    return %arg0, %c0_i32, %c0_i32_0 : i32, i32, i32
  }
  func.func @transform_3(%arg0: i32, %arg1: i32) -> (i32, i32, i32) {
    %c0_i32 = arith.constant 0 : i32
    %c0_i32_0 = arith.constant 0 : i32
    %c0_i32_1 = arith.constant 0 : i32
    return %arg0, %c0_i32, %c0_i32_0 : i32, i32, i32
  }
  func.func @transform_4(%arg0: i32, %arg1: i32) -> (i32, i32, i32) {
    %c0_i32 = arith.constant 0 : i32
    %c0_i32_0 = arith.constant 0 : i32
    %c0_i32_1 = arith.constant 0 : i32
    return %arg0, %c0_i32, %c0_i32_0 : i32, i32, i32
  }
  func.func @transform_5(%arg0: i32, %arg1: i32) -> (i32, i32, i32) {
    %c0_i32 = arith.constant 0 : i32
    %c0_i32_0 = arith.constant 0 : i32
    %c0_i32_1 = arith.constant 0 : i32
    return %arg0, %c0_i32, %c0_i32_0 : i32, i32, i32
  }
  func.func @transform_6(%arg0: i32, %arg1: i32) -> (i32, i32, i32) {
    %c0_i32 = arith.constant 0 : i32
    %c0_i32_0 = arith.constant 0 : i32
    %c0_i32_1 = arith.constant 0 : i32
    return %arg0, %c0_i32, %c0_i32_0 : i32, i32, i32
  }
  func.func @transform_7(%arg0: i32, %arg1: i32) -> (i32, i32, i32) {
    %c0_i32 = arith.constant 0 : i32
    %c0_i32_0 = arith.constant 0 : i32
    %c0_i32_1 = arith.constant 0 : i32
    return %arg0, %c0_i32, %c0_i32_0 : i32, i32, i32
  }
  func.func @transform_8(%arg0: i32, %arg1: i32) -> (i32, i32, i32) {
    %c0_i32 = arith.constant 0 : i32
    %c0_i32_0 = arith.constant 0 : i32
    %c0_i32_1 = arith.constant 0 : i32
    return %arg0, %c0_i32, %c0_i32_0 : i32, i32, i32
  }
  func.func @transform_9(%arg0: i32, %arg1: i32) -> (i32, i32, i32) {
    %c0_i32 = arith.constant 0 : i32
    %c0_i32_0 = arith.constant 0 : i32
    return %arg0, %arg1, %c0_i32 : i32, i32, i32
  }
}

</mosaic_0001>

<bundles_post_ra>
// kernel: network_forward.1
= control target key start
LH: loop header
LB: loop body
LE: loop exit
PB: predicated region body
PF: predicated region fallthrough
CT: control target
= control target key end

     0   :  { %14 = vsyncpa [#allocation3], 0  ;;  %s2614_s0 = inlined_call_operand.vmem [shape: bf16[8,144], index: 0, kind: input, shape index: {}]   ;;  %s2615_s1 = inlined_call_operand.vmem [shape: bf16[2,144,512], index: 1, kind: input, shape index: {}]   ;;  %s2616_s2 = inlined_call_operand.vmem [shape: f32[2,1,512], index: 2, kind: input, shape index: {}]   ;;  %s2617_s3 = inlined_call_operand.hbm [shape: bf16[2,512,256], index: 3, kind: input, shape index: {}]   ;;  %s2618_s4 = inlined_call_operand.vmem [shape: f32[2,1,256], index: 4, kind: input, shape index: {}]   ;;  %s2619_s5 = inlined_call_operand.vmem [shape: bf16[2,256,128], index: 5, kind: input, shape index: {}]   ;;  %s2620_s6 = inlined_call_operand.vmem [shape: f32[2,1,128], index: 6, kind: input, shape index: {}]   ;;  %s2621_s7 = inlined_call_operand.vmem [shape: f32[2,128,1], index: 7, kind: input, shape index: {}]   ;;  %s2622_s8 = inlined_call_operand.vmem [shape: f32[2,1,1], index: 8, kind: input, shape index: {}]   ;;  %s2623_s9 = inlined_call_operand.vmem [shape: f32[2,8,1], index: 9, kind: output, shape index: {}]  }
   0x1   :  { %16 = vsyncpa [#allocation3 + $0x1], 0  ;;  %s2286_s30 = smov 0   ;;  %s2288_s10 = smov 0  }
   0x2   :  { %s2290_s11 = smov 0   ;;  %s2292_s12 = smov 0  }
   0x3   :  { %s2294_s13 = smov 0   ;;  %s2296_s14 = smov 0  }
   0x4 LB: > { %s1752_s15 = sadd.s32 4294967295, %s2231_s14   ;;  %s34_s16 = sadd.s32 1, %s2227_s13  ;;  %s2231_s14 = sphi %s2296_s14, %s22_s14   ;;  %s2227_s13 = sphi %s2294_s13, %s2631_s13   ;;  %s2223_s12 = sphi %s2292_s12, %s2630_s12   ;;  %s2219_s11 = sphi %s2290_s11, %s2629_s11   ;;  %s2215_s10 = sphi %s2288_s10, %s2628_s10   ;;  %s2211_s30 = sphi %s2286_s30, %s2627_s30  }
   0x5   : > { %p36_p0 = scmp.ge.s32.totalorder %s34_s16, 2  ;;  %s119_s17 = sadd.s32 1, %s2219_s11 }
   0x6   : > { %p126_p1 = scmp.ne.s32.totalorder %s2219_s11, %s2215_s10  ;;  %p127_p2 = scmp.eq.s32.totalorder %s2231_s14, 0 }
   0x7   : > { %s2633_s16 = smov (%p36_p0, %s34_s16), 0  ;;  %p132_p4 = scmp.ne.s32.totalorder %s2215_s10, %s2211_s30 }
   0x8   : > { %p2322_p3 = por %p127_p2, %p126_p1  ;;  %s116_s19 = ssub.s32 %s2227_s13, %s2633_s16 }
   0x9   : > { %p133_p5 = scmp.eq.s32.totalorder %s1752_s15, 0  ;;  %p117_p6 = scmp.eq.s32.totalorder %s116_s19, 0 }
   0xa   : > { %p1932_p8 = scmp.lt.s32.totalorder %s2231_s14, 2  ;;  %s337_s22 = sand.u32 1, %s2219_s11  }
   0xb   : > { %p2329_p7 = por %p133_p5, %p132_p4  ;;  %s1894_s23 = sshll.u32 %s2227_s13, 13 }
   0xc   : > { %s2335_s21 = scalar_select %p117_p6, %s2219_s11, %s119_s17  }
   0xd   : > { %s1757_s24 = sshll.u32 %s337_s22, 9  ;;  %s2342_s27 = scalar_lea.hbm %s2617_s3, %s1894_s23 }
   0xe   : > { %s341_s28 = scalar_lea.vmem [#allocation2], %s1757_s24  ;;  %p2346_p9 = pnand %p1932_p8, %p2322_p3 }
   0xf   : > { %s348_s29 = sshll.u32 %s341_s28, 4  ;;  %s2352_s15 = scalar_lea.sflag [#allocation3], %s337_s22  ;;  %s2350_s29 = int_to_ptr.vmem [resolvable:$true] %s348_s29 }
  0x10   : > { %s2151_s17 = scalar_lea.hbm %s2342_s27, 8192  ;;  %p2153_p11 = pneg %p2346_p9 }
  0x11   : > { %p2152_p10 = scmp.ne.s32.totalorder %s2342_s27, %s2151_s17  ;;  %s2156_s23 = scalar_lea.hbm %s2617_s3, 16384 }
  0x12   : > { %p2157_p0 = scmp.lt.u32.totalorder %s2342_s27, %s2617_s3  ;;  %p2158_p1 = scmp.lt.u32.totalorder %s2156_s23, %s2151_s17 }
  0x13   : > { %p2154_p12 = pnand %p2153_p11, %p2152_p10  ;;  %p2160_p3 = scmp.lt.u32.totalorder %s2151_s17, %s2342_s27 }
  0x14   : > { %p2159_p2 = por %p2158_p1, %p2157_p0 }
  0x15   : > { %p2155_p13 = pneg %p2154_p12 }
  0x16   : > { %p2161_p4 = por %p2160_p3, %p2159_p2 }
  0x18   : > { %p2162_p5 = pnand %p2161_p4, %p2155_p13 }
  0x1a   : > { %2165 = shalt.err (!%p2162_p5)
}
  0x1b   : > { %s2166_s22 = scalar_lea.vmem %s2350_s29, 8192  ;;  %s2233_s26 = smov [#allocation2]  }
  0x1c   : > { %p2167_p6 = scmp.ne.s32.totalorder %s2350_s29, %s2166_s22  ;;  %s2171_s28 = sshll.u32 %s2233_s26, 4  ;;  %s2172_s28 = int_to_ptr.vmem [resolvable:$false] %s2171_s28 }
  0x1d   : > { %s2173_s19 = scalar_lea.vmem %s2172_s28, 16384  ;;  %p2174_p12 = scmp.lt.s32.totalorder %s2350_s29, %s2172_s28 }
  0x1e   : > { %p2169_p8 = pnand %p2167_p6, %p2153_p11  ;;  %p2175_p0 = scmp.lt.s32.totalorder %s2173_s19, %s2166_s22 }
  0x20   : > { %p2170_p10 = pneg %p2169_p8  ;;  %p2176_p1 = por %p2175_p0, %p2174_p12 }
  0x22   : > { %p2177_p2 = pnand %p2176_p1, %p2170_p10 }
  0x24   : > { %2180 = shalt.err (!%p2177_p2)
}
  0x25   : > { %s2234_s17 = smov 128   ;;  %s2235_s18 = smov 8  }
  0x26   : > { %1931 = dma.hbm_to_vmem [thread:$0]  (!%p2346_p9), %s2342_s27, 8192, %s2350_s29, %s2352_s15, %s2234_s17, %s2234_s17, %s2235_s18  }
  0x27   : > { %p1760_p11 = scmp.ge.s32.totalorder %s2231_s14, 1  ;;  %p391_p13 = scmp.lt.s32.totalorder %s2231_s14, 3 }
  0x29   : > { %p392_p3 = pnand %p1760_p11, %p391_p13 }
  0x2a   : > { %s397_s23 = sand.u32 (!%p392_p3), 1, %s2215_s10  }
  0x2b   : > { %395 = sbr.rel (%p392_p3) target bundleno = 964 (0x3c4), region = 56  ;;  %s1761_s24 = sshll.u32 (!%p392_p3), %s397_s23, 9 }
  0x2c   : > { %s398_s25 = scalar_lea.sflag (!%p392_p3), [#allocation3], %s397_s23  ;;  %s2383_s22 = scalar_lea.vmem (!%p392_p3), [#allocation2], %s1761_s24 }
  0x32   : > { %2206 = dma.done.wait (%p2329_p7), %s398_s25, 8192  }
  0x33   : > { %2208 = vsyncadd (%p2329_p7), %s398_s25, 4294959104  ;;  %p477_p4 = scmp.lt.s32.totalorder %s2223_s12, 1  ;;  %v514_v9 = vld [vmem:[%s2614_s0] sm:$0xff]  ;;  %vm759_vm0 = vcmask 130048   ;;  %v2042_v20 = vld [vmem:[%s2383_s22 + $0x14] ss:$8 sps:$4 sm:$0xff]  }
  0x34   : > { %v1771_v10 = vcombine.high %v514_v9, %v514_v9  ;;  %v2039_v17 = vld [vmem:[%s2383_s22 + $0x4] ss:$8 sps:$4 sm:$0xff]   ;;  %v2041_v18 = vld [vmem:[%s2383_s22] ss:$8 sps:$4 sm:$0xff]   ;;  %v2044_v22 = vld [vmem:[%s2383_s22 + $0x10] ss:$8 sps:$4 sm:$0xff]   ;;  %v2429_v28 = vcombine.low %v514_v9, %v514_v9 }
  0x35   : > { %s2635_s12 = smov (!%p477_p4, %s2223_s12), 1  ;;  %1249 = vmatprep.subr.bf16.mxu0 %v2039_v17  ;;  %v2045_v23 = vld [vmem:[%s2383_s22 + $0x24] ss:$8 sps:$4 sm:$0xff]   ;;  %v2047_v26 = vld [vmem:[%s2383_s22 + $0x20] ss:$8 sps:$4 sm:$0xff]   ;;  %vm1574_vm1 = vcmask 7168  }
  0x36   : > { %s1925_s27 = smul.u32 288, %s2635_s12  ;;  %1808 = vmatprep.mubr.msk.bf16.mxu1 %vm759_vm0, %v1771_v10  ;;  %1250 = vmatpush1.bf16.msra.mxu0 %v2041_v18  ;;  %v2048_v27 = vld [vmem:[%s2383_s22 + $0x34] ss:$8 sps:$4 sm:$0xff]   ;;  %v2050_v31 = vld [vmem:[%s2383_s22 + $0x30] ss:$8 sps:$4 sm:$0xff]   ;;  %s1895_s28 = sshll.u32 %s2635_s12, 7 }
  0x37   : > { %1251 = vmatprep.subr.bf16.mxu0 %v2042_v20  ;;  %v2051_v32 = vld [vmem:[%s2383_s22 + $0x44] ss:$8 sps:$4 sm:$0xff]   ;;  %v2053_v35 = vld [vmem:[%s2383_s22 + $0x40] ss:$8 sps:$4 sm:$0xff]   ;;  %v2054_v37 = vld [vmem:[%s2383_s22 + $0x54] ss:$8 sps:$4 sm:$0xff]   ;;  %s2483_s18 = scalar_lea.vmem %s2619_s5, %s1895_s28  ;;  %v553_v20 = vlaneseq  ;;  %s505_s25 = scalar_lea.vmem %s2622_s8, %s2635_s12 }
  0x38   : > { %s2397_s15 = scalar_lea.vmem %s2615_s1, %s1925_s27  ;;  %v2056_v39 = vld [vmem:[%s2383_s22 + $0x50] ss:$8 sps:$4 sm:$0xff]   ;;  %v2057_v40 = vld [vmem:[%s2383_s22 + $0x64] ss:$8 sps:$4 sm:$0xff]   ;;  %v2059_v43 = vld [vmem:[%s2383_s22 + $0x60] ss:$8 sps:$4 sm:$0xff]  }
  0x39   : > { %v1983_v0 = vld [vmem:[%s2397_s15 + $0x4] ss:$16 sps:$4 sm:$0xff]   ;;  %v1985_v1 = vld [vmem:[%s2397_s15] ss:$16 sps:$4 sm:$0xff]   ;;  %v2014_v25 = vld [vmem:[%s2397_s15 + $0xc] ss:$16 sps:$4 sm:$0xff]  }
  0x3a   : > { %763 = vmatprep.subr.bf16.mxu1 %v1983_v0  ;;  %v1986_v2 = vld [vmem:[%s2397_s15 + $0x24] ss:$16 sps:$4 sm:$0xff]   ;;  %v1988_v3 = vld [vmem:[%s2397_s15 + $0x20] ss:$16 sps:$4 sm:$0xff]   ;;  %1252 = vmatpush1.bf16.msra.mxu0 %v2044_v22  ;;  %v2012_v29 = vld [vmem:[%s2397_s15 + $0x8] ss:$16 sps:$4 sm:$0xff]  }
  0x3b   : > { %764 = vmatpush1.bf16.msra.mxu1 %v1985_v1  ;;  %v1989_v4 = vld [vmem:[%s2397_s15 + $0x44] ss:$16 sps:$4 sm:$0xff]   ;;  %v1991_v5 = vld [vmem:[%s2397_s15 + $0x40] ss:$16 sps:$4 sm:$0xff]   ;;  %1253 = vmatprep.subr.bf16.mxu0 %v2045_v23  ;;  %v2017_v30 = vld [vmem:[%s2397_s15 + $0x2c] ss:$16 sps:$4 sm:$0xff]  }
  0x3c   : > { %765 = vmatprep.subr.bf16.mxu1 %v1986_v2  ;;  %v1992_v6 = vld [vmem:[%s2397_s15 + $0x64] ss:$16 sps:$4 sm:$0xff]   ;;  %v1994_v7 = vld [vmem:[%s2397_s15 + $0x60] ss:$16 sps:$4 sm:$0xff]   ;;  %v2015_v33 = vld [vmem:[%s2397_s15 + $0x28] ss:$16 sps:$4 sm:$0xff]  }
  0x3d   : > { %v1995_v8 = vld [vmem:[%s2397_s15 + $0x84] ss:$16 sps:$4 sm:$0xff]   ;;  %v1997_v11 = vld [vmem:[%s2397_s15 + $0x80] ss:$16 sps:$4 sm:$0xff]   ;;  %v2020_v34 = vld [vmem:[%s2397_s15 + $0x4c] ss:$16 sps:$4 sm:$0xff]  }
  0x3e   : > { %v1998_v12 = vld [vmem:[%s2397_s15 + $0xa4] ss:$16 sps:$4 sm:$0xff]   ;;  %v2000_v13 = vld [vmem:[%s2397_s15 + $0xa0] ss:$16 sps:$4 sm:$0xff]   ;;  %1254 = vmatpush1.bf16.msra.mxu0 %v2047_v26  ;;  %v2018_v36 = vld [vmem:[%s2397_s15 + $0x48] ss:$16 sps:$4 sm:$0xff]  }
  0x3f   : > { %766 = vmatpush1.bf16.msra.mxu1 %v1988_v3  ;;  %v2001_v14 = vld [vmem:[%s2397_s15 + $0xc4] ss:$16 sps:$4 sm:$0xff]   ;;  %v2003_v15 = vld [vmem:[%s2397_s15 + $0xc0] ss:$16 sps:$4 sm:$0xff]   ;;  %1255 = vmatprep.subr.bf16.mxu0 %v2048_v27  ;;  %v2023_v38 = vld [vmem:[%s2397_s15 + $0x6c] ss:$16 sps:$4 sm:$0xff]  }
  0x40   : > { %767 = vmatprep.subr.bf16.mxu1 %v1989_v4  ;;  %v2004_v16 = vld [vmem:[%s2397_s15 + $0xe4] ss:$16 sps:$4 sm:$0xff]   ;;  %v2006_v19 = vld [vmem:[%s2397_s15 + $0xe0] ss:$16 sps:$4 sm:$0xff]   ;;  %v2021_v41 = vld [vmem:[%s2397_s15 + $0x68] ss:$16 sps:$4 sm:$0xff]  }
  0x41   : > { %v2007_v21 = vld [vmem:[%s2397_s15 + $0x104] ss:$16 sps:$4 sm:$0xff]   ;;  %v2009_v24 = vld [vmem:[%s2397_s15 + $0x100] ss:$16 sps:$4 sm:$0xff]   ;;  %v2026_v42 = vld [vmem:[%s2397_s15 + $0x8c] ss:$16 sps:$4 sm:$0xff]  }
  0x42   : > { %1256 = vmatpush1.bf16.msra.mxu0 %v2050_v31  ;;  %v2060_v44 = vld [vmem:[%s2383_s22 + $0x74] ss:$8 sps:$4 sm:$0xff]   ;;  %v2024_v45 = vld [vmem:[%s2397_s15 + $0x88] ss:$16 sps:$4 sm:$0xff]   ;;  %v2063_v48 = vld [vmem:[%s2383_s22 + $0x84] ss:$8 sps:$4 sm:$0xff]  }
  0x43   : > { %768 = vmatpush1.bf16.msra.mxu1 %v1991_v5  ;;  %1257 = vmatprep.subr.bf16.mxu0 %v2051_v32  ;;  %v2029_v46 = vld [vmem:[%s2397_s15 + $0xac] ss:$16 sps:$4 sm:$0xff]   ;;  %v2062_v47 = vld [vmem:[%s2383_s22 + $0x70] ss:$8 sps:$4 sm:$0xff]   ;;  %v2065_v51 = vld [vmem:[%s2383_s22 + $0x80] ss:$8 sps:$4 sm:$0xff]  }
  0x44   : > { %769 = vmatprep.subr.bf16.mxu1 %v1992_v6  ;;  %v2027_v49 = vld [vmem:[%s2397_s15 + $0xa8] ss:$16 sps:$4 sm:$0xff]   ;;  %v2032_v50 = vld [vmem:[%s2397_s15 + $0xcc] ss:$16 sps:$4 sm:$0xff]   ;;  %v2136_v9 = vld [vmem:[%s2483_s18] sm:$0xff]   ;;  %s1763_s23 = sshll.u32 %s2635_s12, 2 }
  0x45   : > { %v2066_v52 = vld [vmem:[%s2383_s22 + $0x94] ss:$8 sps:$4 sm:$0xff]   ;;  %v2030_v53 = vld [vmem:[%s2397_s15 + $0xc8] ss:$16 sps:$4 sm:$0xff]   ;;  %v2069_v56 = vld [vmem:[%s2383_s22 + $0xa4] ss:$8 sps:$4 sm:$0xff]   ;;  %s485_s27 = scalar_lea.vmem %s2616_s2, %s1763_s23 }
  0x46   : > { %1258 = vmatpush1.bf16.msra.mxu0 %v2053_v35  ;;  %v2035_v54 = vld [vmem:[%s2397_s15 + $0xec] ss:$16 sps:$4 sm:$0xff]   ;;  %v2068_v55 = vld [vmem:[%s2383_s22 + $0x90] ss:$8 sps:$4 sm:$0xff]   ;;  %v2071_v59 = vld [vmem:[%s2383_s22 + $0xa0] ss:$8 sps:$4 sm:$0xff]  }
  0x47   : > { %770 = vmatpush1.bf16.msra.mxu1 %v1994_v7  ;;  %1259 = vmatprep.subr.bf16.mxu0 %v2054_v37  ;;  %v2033_v57 = vld [vmem:[%s2397_s15 + $0xe8] ss:$16 sps:$4 sm:$0xff]   ;;  %v2038_v58 = vld [vmem:[%s2397_s15 + $0x10c] ss:$16 sps:$4 sm:$0xff]   ;;  %v2144_v17 = vld [vmem:[%s2483_s18 + $0x20] sm:$0xff]  }
  0x48   : > { %771 = vmatprep.subr.bf16.mxu1 %v1995_v8  ;;  %v2072_v60 = vld [vmem:[%s2383_s22 + $0xb4] ss:$8 sps:$4 sm:$0xff]   ;;  %v2036_v61 = vld [vmem:[%s2397_s15 + $0x108] ss:$16 sps:$4 sm:$0xff]   ;;  %v2075_v63 = vld [vmem:[%s2383_s22 + $0xc4] ss:$8 sps:$4 sm:$0xff]   ;;  %s2558_s15 = scalar_lea.vmem %s2621_s7, %s1895_s28 }
  0x49   : > { %v2074_v62 = vld [vmem:[%s2383_s22 + $0xb0] ss:$8 sps:$4 sm:$0xff]   ;;  %v2077_v0 = vld [vmem:[%s2383_s22 + $0xc0] ss:$8 sps:$4 sm:$0xff]   ;;  %v2078_v1 = vld [vmem:[%s2383_s22 + $0xd4] ss:$8 sps:$4 sm:$0xff]  }
  0x4a   : > { %1260 = vmatpush1.bf16.msra.mxu0 %v2056_v39  ;;  %v2080_v2 = vld [vmem:[%s2383_s22 + $0xd0] ss:$8 sps:$4 sm:$0xff]   ;;  %v2081_v3 = vld [vmem:[%s2383_s22 + $0xe4] ss:$8 sps:$4 sm:$0xff]   ;;  %v2083_v4 = vld [vmem:[%s2383_s22 + $0xe0] ss:$8 sps:$4 sm:$0xff]  }
  0x4b   : > { %772 = vmatpush1.bf16.msra.mxu1 %v1997_v11  ;;  %1261 = vmatprep.subr.bf16.mxu0 %v2057_v40  ;;  %v2084_v5 = vld [vmem:[%s2383_s22 + $0xf4] ss:$8 sps:$4 sm:$0xff]   ;;  %v2086_v6 = vld [vmem:[%s2383_s22 + $0xf0] ss:$8 sps:$4 sm:$0xff]   ;;  %v2089_v7 = vld [vmem:[%s2383_s22 + $0x104] ss:$8 sps:$4 sm:$0xff]  }
  0x4c   : > { %773 = vmatprep.subr.bf16.mxu1 %v1998_v12  ;;  %v2135_v8 = vld [vmem:[%s2483_s18 + $0x40] sm:$0xff]   ;;  %v2138_v11 = vld [vmem:[%s2483_s18 + $0x8] sm:$0xff]   ;;  %v2139_v12 = vld [vmem:[%s2483_s18 + $0x50] sm:$0xff]  }
  0x4d   : > { %v2145_v18 = vld [vmem:[%s2483_s18 + $0x68] sm:$0xff]   ;;  %v2506_v23 = vld [vmem:[%s485_s27] sm:$0xf]  ;;  %v2090_v39 = vld [vmem:[%s2383_s22 + $0x110] ss:$8 sps:$4 sm:$0xff]   ;;  %s1769_s27 = sshll.u32 %s2635_s12, 3 }
  0x4e   : > { %1262 = vmatpush1.bf16.msra.mxu0 %v2059_v43  ;;  %v2095_v40 = vld [vmem:[%s2383_s22 + $0x124] ss:$8 sps:$4 sm:$0xff]   ;;  %v2096_v43 = vld [vmem:[%s2383_s22 + $0x130] ss:$8 sps:$4 sm:$0xff]  }
  0x4f   : > { %774 = vmatpush1.bf16.msra.mxu1 %v2000_v13  ;;  %1263 = vmatprep.subr.bf16.mxu0 %v2060_v44  ;;  %v2140_v13 = vld [vmem:[%s2483_s18 + $0x10] sm:$0xff]   ;;  %v2101_v44 = vld [vmem:[%s2383_s22 + $0x144] ss:$8 sps:$4 sm:$0xff]  }
  0x50   : > { %775 = vmatprep.subr.bf16.mxu1 %v2001_v14  ;;  %v2141_v14 = vld [vmem:[%s2483_s18 + $0x58] sm:$0xff]  }
  0x52   : > { %1264 = vmatpush1.bf16.msra.mxu0 %v2062_v47  ;;  %v2102_v47 = vld [vmem:[%s2383_s22 + $0x150] ss:$8 sps:$4 sm:$0xff]  }
  0x53   : > { %776 = vmatpush1.bf16.msra.mxu1 %v2003_v15  ;;  %1265 = vmatprep.subr.bf16.mxu0 %v2063_v48  ;;  %v2142_v15 = vld [vmem:[%s2483_s18 + $0x18] sm:$0xff]   ;;  %v2107_v48 = vld [vmem:[%s2383_s22 + $0x164] ss:$8 sps:$4 sm:$0xff]  }
  0x54   : > { %777 = vmatprep.subr.bf16.mxu1 %v2004_v16  ;;  %v2143_v16 = vld [vmem:[%s2483_s18 + $0x60] sm:$0xff]  }
  0x56   : > { %1266 = vmatpush1.bf16.msra.mxu0 %v2065_v51  ;;  %v2110_v51 = vld [vmem:[%s2383_s22 + $0x174] ss:$8 sps:$4 sm:$0xff]  }
  0x57   : > { %778 = vmatpush1.bf16.msra.mxu1 %v2006_v19  ;;  %1267 = vmatprep.subr.bf16.mxu0 %v2066_v52  ;;  %v2146_v19 = vld [vmem:[%s2483_s18 + $0x28] sm:$0xff]   ;;  %v2108_v52 = vld [vmem:[%s2383_s22 + $0x170] ss:$8 sps:$4 sm:$0xff]  }
  0x58   : > { %779 = vmatprep.subr.bf16.mxu1 %v2007_v21  ;;  %v2498_v21 = vshrl.u32 %v553_v20, 7  ;;  %v2149_v20 = vld [vmem:[%s2483_s18 + $0x78] sm:$0xff]  }
  0x5a   : > { %1268 = vmatpush1.bf16.msra.mxu0 %v2068_v55  ;;  %v2504_v22 = vsub.s32 0, %v2498_v21 }
  0x5b   : > { %780 = vmatpush1.bf16.msra.mxu1 %v2009_v24  ;;  %1269 = vmatprep.subr.bf16.mxu0 %v2069_v56  ;;  %v559_v24 = vsub.s32 1, %v2498_v21 }
  0x5c   : > { %804 = vmatprep.subr.bf16.mxu1 %v2014_v25  ;;  %v556_v25 = vrot.slane %v2506_v23, %v2504_v22 }
  0x5d   : > { %v560_v26 = vrot.slane %v2506_v23, %v559_v24 }
  0x5e   : > { %796 = vmatmul.mubr.bf16.vlgmr.msra.gmra.mrb[0].mxu1 %v2429_v28  ;;  %1270 = vmatpush1.bf16.msra.mxu0 %v2071_v59 }
  0x5f   : > { %805 = vmatpush1.bf16.msra.mxu1 %v2012_v29  ;;  %1809 = vmatprep.mubr.msk.bf16.mxu1 %vm759_vm0, %v1771_v10  ;;  %v2137_v10 = vld [vmem:[%s2483_s18 + $0x48] sm:$0xff]  }
  0x60   : > { %806 = vmatprep.subr.bf16.mxu1 %v2017_v30  ;;  %1271 = vmatprep.subr.bf16.mxu0 %v2072_v60  ;;  %v2116_v60 = vld [vmem:[%s2383_s22 + $0x194] ss:$8 sps:$4 sm:$0xff]  }
  0x62   : > { %1272 = vmatpush1.bf16.msra.mxu0 %v2074_v62 }
  0x63   : > { %807 = vmatpush1.bf16.msra.mxu1 %v2015_v33  ;;  %1273 = vmatprep.subr.bf16.mxu0 %v2075_v63  ;;  %v2114_v63 = vld [vmem:[%s2383_s22 + $0x190] ss:$8 sps:$4 sm:$0xff]  }
  0x64   : > { %808 = vmatprep.subr.bf16.mxu1 %v2020_v34 }
  0x66   : > { %1274 = vmatpush1.bf16.msra.mxu0 %v2077_v0 }
  0x67   : > { %809 = vmatpush1.bf16.msra.mxu1 %v2018_v36  ;;  %1275 = vmatprep.subr.bf16.mxu0 %v2078_v1  ;;  %v2087_v36 = vld [vmem:[%s2383_s22 + $0x100] ss:$8 sps:$4 sm:$0xff]   ;;  %v2119_v1 = vld [vmem:[%s2383_s22 + $0x1a4] ss:$8 sps:$4 sm:$0xff]  }
  0x68   : > { %810 = vmatprep.subr.bf16.mxu1 %v2023_v38  ;;  %v2092_v38 = vld [vmem:[%s2383_s22 + $0x114] ss:$8 sps:$4 sm:$0xff]  }
  0x6a   : > { %1276 = vmatpush1.bf16.msra.mxu0 %v2080_v2  ;;  %v2117_v2 = vld [vmem:[%s2383_s22 + $0x1a0] ss:$8 sps:$4 sm:$0xff]  }
  0x6b   : > { %811 = vmatpush1.bf16.msra.mxu1 %v2021_v41  ;;  %1277 = vmatprep.subr.bf16.mxu0 %v2081_v3  ;;  %v2093_v41 = vld [vmem:[%s2383_s22 + $0x120] ss:$8 sps:$4 sm:$0xff]   ;;  %v2122_v3 = vld [vmem:[%s2383_s22 + $0x1b4] ss:$8 sps:$4 sm:$0xff]  }
  0x6c   : > { %812 = vmatprep.subr.bf16.mxu1 %v2026_v42  ;;  %v2098_v42 = vld [vmem:[%s2383_s22 + $0x134] ss:$8 sps:$4 sm:$0xff]  }
  0x6e   : > { %1278 = vmatpush1.bf16.msra.mxu0 %v2083_v4  ;;  %v2120_v4 = vld [vmem:[%s2383_s22 + $0x1b0] ss:$8 sps:$4 sm:$0xff]  }
  0x6f   : > { %813 = vmatpush1.bf16.msra.mxu1 %v2024_v45  ;;  %1279 = vmatprep.subr.bf16.mxu0 %v2084_v5  ;;  %v2099_v45 = vld [vmem:[%s2383_s22 + $0x140] ss:$8 sps:$4 sm:$0xff]   ;;  %v2125_v5 = vld [vmem:[%s2383_s22 + $0x1c4] ss:$8 sps:$4 sm:$0xff]  }
  0x70   : > { %814 = vmatprep.subr.bf16.mxu1 %v2029_v46  ;;  %v2104_v46 = vld [vmem:[%s2383_s22 + $0x154] ss:$8 sps:$4 sm:$0xff]  }
  0x72   : > { %1280 = vmatpush1.bf16.msra.mxu0 %v2086_v6  ;;  %v2123_v6 = vld [vmem:[%s2383_s22 + $0x1c0] ss:$8 sps:$4 sm:$0xff]  }
  0x73   : > { %815 = vmatpush1.bf16.msra.mxu1 %v2027_v49  ;;  %1290 = vmatprep.subr.bf16.mxu0 %v2089_v7  ;;  %v2105_v49 = vld [vmem:[%s2383_s22 + $0x160] ss:$8 sps:$4 sm:$0xff]   ;;  %v563_v7 = vsub.s32 2, %v2498_v21 }
  0x74   : > { %816 = vmatprep.subr.bf16.mxu1 %v2032_v50  ;;  %v567_v50 = vsub.s32 3, %v2498_v21 }
  0x77   : > { %817 = vmatpush1.bf16.msra.mxu1 %v2030_v53  ;;  %v568_v53 = vrot.slane %v2506_v23, %v567_v50 }
  0x78   : > { %818 = vmatprep.subr.bf16.mxu1 %v2035_v54  ;;  %v2113_v54 = vld [vmem:[%s2383_s22 + $0x184] ss:$8 sps:$4 sm:$0xff]  }
  0x7b   : > { %819 = vmatpush1.bf16.msra.mxu1 %v2033_v57  ;;  %v2111_v57 = vld [vmem:[%s2383_s22 + $0x180] ss:$8 sps:$4 sm:$0xff]  }
  0x7c   : > { %820 = vmatprep.subr.bf16.mxu1 %v2038_v58 }
  0x7f   : > { %821 = vmatpush1.bf16.msra.mxu1 %v2036_v61 }
  0x80   : > { %1897 = vmatprep.subr.bf16.mxu1 %v2135_v8  ;;  %v2128_v8 = vld [vmem:[%s2383_s22 + $0x1d4] ss:$8 sps:$4 sm:$0xff]  }
  0x82   : > { %837 = vmatmul.mubr.bf16.vlgmr.msra.gmra.mrb[4].mxu1 %v2429_v28 }
  0x83   : > { %1898 = vmatpush3.bf16.msra.mxu1 %v2136_v9  ;;  %v2126_v9 = vld [vmem:[%s2383_s22 + $0x1d0] ss:$8 sps:$4 sm:$0xff]  }
  0x84   : > { %1899 = vmatprep.subr.bf16.mxu1 %v2137_v10  ;;  %v564_v10 = vrot.slane %v2506_v23, %v563_v7  ;;  %v2150_v23 = vld [vmem:[%s2483_s18 + $0x38] sm:$0xff]  }
  0x87   : > { %1900 = vmatpush3.bf16.msra.mxu1 %v2138_v11  ;;  %v2131_v11 = vld [vmem:[%s2383_s22 + $0x1e4] ss:$8 sps:$4 sm:$0xff]  }
  0x88   : > { %1901 = vmatprep.subr.bf16.mxu1 %v2139_v12  ;;  %v2129_v12 = vld [vmem:[%s2383_s22 + $0x1e0] ss:$8 sps:$4 sm:$0xff]  }
  0x8b   : > { %1902 = vmatpush3.bf16.msra.mxu1 %v2140_v13 }
  0x8c   : > { %1903 = vmatprep.subr.bf16.mxu1 %v2141_v14  ;;  %v2134_v14 = vld [vmem:[%s2383_s22 + $0x1f4] ss:$8 sps:$4 sm:$0xff]  }
  0x8f   : > { %1904 = vmatpush3.bf16.msra.mxu1 %v2142_v15  ;;  %v2132_v15 = vld [vmem:[%s2383_s22 + $0x1f0] ss:$8 sps:$4 sm:$0xff]   ;;  %s1764_s22 = sshll.u32 %s2635_s12, 1 }
  0x90   : > { %1905 = vmatprep.subr.bf16.mxu1 %v2143_v16  ;;  %s489_s28 = scalar_lea.vmem %s2618_s4, %s1764_s22 }
  0x93   : > { %1906 = vmatpush3.bf16.msra.mxu1 %v2144_v17 }
  0x94   : > { %1907 = vmatprep.subr.bf16.mxu1 %v2145_v18  ;;  %v2147_v18 = vld [vmem:[%s2483_s18 + $0x70] sm:$0xff]  }
  0x97   : > { %1908 = vmatpush3.bf16.msra.mxu1 %v2146_v19  ;;  %v2148_v19 = vld [vmem:[%s2483_s18 + $0x30] sm:$0xff]   ;;  %s497_s18 = scalar_lea.vmem %s2620_s6, %s2635_s12 }
  0x98   : > { %1909 = vmatprep.subr.bf16.mxu1 %v2147_v18 }
  0x9b   : > { %1910 = vmatpush3.bf16.msra.mxu1 %v2148_v19 }
  0x9c   : > { %1911 = vmatprep.subr.bf16.mxu1 %v2149_v20 }
  0x9f   : > { %1912 = vmatpush3.bf16.msra.mxu1 %v2150_v23 }
 0x131   : > { %v797_v27 = vpop.f32.mrb[0].mxu1 }
 0x132   : > { %v798_v28 = vadd.f32 %v797_v27, %v556_v25  ;;  %v799_v29 = vpop.f32.mrb[1].mxu1  ;;  %v1511_v25 = vld [vmem:[%s2558_s15] sm:$0xff]  ;;  %v1513_v27 = vld [vmem:[%s2558_s15 + $0x10] sm:$0xff] }
 0x133   : > { %v800_v30 = vadd.f32 %v799_v29, %v560_v26  ;;  %v801_v31 = vpop.f32.mrb[2].mxu1  ;;  %1527 = vxpose.xlu0.b32.start [1/16] (narrow) %v1511_v25, 8  ;;  %v1512_v26 = vld [vmem:[%s2558_s15 + $0x8] sm:$0xff]  ;;  %v1515_v29 = vld [vmem:[%s2558_s15 + $0x20] sm:$0xff] }
 0x134   : > { %v845_v32 = vmax.f32 %v798_v28, 0.0  ;;  %v802_v33 = vpop.f32.mrb[3].mxu1  ;;  %v1514_v28 = vld [vmem:[%s2558_s15 + $0x18] sm:$0xff]  ;;  %v1517_v31 = vld [vmem:[%s2558_s15 + $0x30] sm:$0xff] }
 0x135   : > { %v846_v34 = vmax.f32 %v800_v30, 0.0  ;;  %v1516_v30 = vld [vmem:[%s2558_s15 + $0x28] sm:$0xff]  ;;  %v1519_v33 = vld [vmem:[%s2558_s15 + $0x40] sm:$0xff] }
 0x136   : > { %v849_v37 = vpack.c.bf16 %v845_v32, %v845_v32  ;;  %v1518_v32 = vld [vmem:[%s2558_s15 + $0x38] sm:$0xff] }
 0x137   : > { %v850_v35 = vpack.c.bf16 %v846_v34, %v846_v34  ;;  %1528 = vxpose.xlu0.b32.cont [2/16] (narrow) %v1512_v26, 8  ;;  %v1520_v34 = vld [vmem:[%s2558_s15 + $0x48] sm:$0xff] }
 0x139   : > { %1281 = vmatprep.mubr.bf16.mxu0 %v850_v35  ;;  %v1521_v35 = vld [vmem:[%s2558_s15 + $0x50] sm:$0xff] }
 0x13a   : > { %1282 = vmatmul.mubr.bf16.vlgmr.msra.gmra.mrb[0].mxu0 %v849_v37  ;;  %v1523_v37 = vld [vmem:[%s2558_s15 + $0x60] sm:$0xff] }
 0x13b   : > { %1291 = vmatpush1.bf16.msra.mxu0 %v2087_v36  ;;  %1529 = vxpose.xlu0.b32.cont [3/16] (narrow) %v1513_v27, 8  ;;  %v1522_v36 = vld [vmem:[%s2558_s15 + $0x58] sm:$0xff] }
 0x13c   : > { %1292 = vmatprep.subr.bf16.mxu0 %v2092_v38  ;;  %v1524_v38 = vld [vmem:[%s2558_s15 + $0x68] sm:$0xff] }
 0x13f   : > { %1293 = vmatpush1.bf16.msra.mxu0 %v2090_v39  ;;  %1530 = vxpose.xlu0.b32.cont [4/16] (narrow) %v1514_v28, 8  ;;  %v1525_v39 = vld [vmem:[%s2558_s15 + $0x70] sm:$0xff] }
 0x140   : > { %1294 = vmatprep.subr.bf16.mxu0 %v2095_v40  ;;  %v1526_v40 = vld [vmem:[%s2558_s15 + $0x78] sm:$0xff]  ;;  %s512_s15 = scalar_lea.vmem %s2623_s9, %s1769_s27 }
 0x143   : > { %1295 = vmatpush1.bf16.msra.mxu0 %v2093_v41  ;;  %1531 = vxpose.xlu0.b32.cont [5/16] (narrow) %v1515_v29, 8  ;;  %v917_v41 = vld [vmem:[%s489_s28] sm:$0x3] }
 0x144   : > { %1296 = vmatprep.subr.bf16.mxu0 %v2098_v42  ;;  %v922_v42 = vrot.slane %v917_v41, %v2504_v22 }
 0x147   : > { %1297 = vmatpush1.bf16.msra.mxu0 %v2096_v43  ;;  %1532 = vxpose.xlu0.b32.cont [6/16] (narrow) %v1516_v30, 8  ;;  %v926_v43 = vrot.slane %v917_v41, %v559_v24 }
 0x148   : > { %1298 = vmatprep.subr.bf16.mxu0 %v2101_v44 }
 0x14b   : > { %1299 = vmatpush1.bf16.msra.mxu0 %v2099_v45  ;;  %1533 = vxpose.xlu0.b32.cont [7/16] (narrow) %v1517_v31, 8 }
 0x14c   : > { %1300 = vmatprep.subr.bf16.mxu0 %v2104_v46 }
 0x14f   : > { %1301 = vmatpush1.bf16.msra.mxu0 %v2102_v47  ;;  %1534 = vxpose.xlu0.b32.cont [8/16] (narrow) %v1518_v32, 8 }
 0x150   : > { %1302 = vmatprep.subr.bf16.mxu0 %v2107_v48 }
 0x153   : > { %1303 = vmatpush1.bf16.msra.mxu0 %v2105_v49  ;;  %1535 = vxpose.xlu0.b32.cont [9/16] (narrow) %v1519_v33, 8 }
 0x154   : > { %1304 = vmatprep.subr.bf16.mxu0 %v2110_v51 }
 0x155   : > { %v838_v55 = vpop.f32.mrb[4].mxu1 }
 0x156   : > { %v840_v56 = vpop.f32.mrb[5].mxu1  ;;  %v839_v13 = vadd.f32 %v838_v55, %v564_v10  ;;  %v1874_v55 = vld [vmem:[%s497_s18] ss:$0 sm:$0xff] }
 0x157   : > { %1305 = vmatpush1.bf16.msra.mxu0 %v2108_v52  ;;  %v841_v58 = vadd.f32 %v840_v56, %v568_v53  ;;  %v842_v59 = vpop.f32.mrb[6].mxu1  ;;  %1536 = vxpose.xlu0.b32.cont [10/16] (narrow) %v1520_v34, 8 }
 0x158   : > { %1306 = vmatprep.subr.bf16.mxu0 %v2113_v54  ;;  %v843_v61 = vpop.f32.mrb[7].mxu1  ;;  %v847_v16 = vmax.f32 %v839_v13, 0.0 }
 0x159   : > { %v848_v62 = vmax.f32 %v841_v58, 0.0 }
 0x15a   : > { %v851_v17 = vpack.c.bf16 %v847_v16, %v847_v16 }
 0x15b   : > { %1307 = vmatpush1.bf16.msra.mxu0 %v2111_v57  ;;  %v852_v0 = vpack.c.bf16 %v848_v62, %v848_v62  ;;  %1537 = vxpose.xlu0.b32.cont [11/16] (narrow) %v1521_v35, 8 }
 0x15c   : > { %1308 = vmatprep.subr.bf16.mxu0 %v2116_v60 }
 0x15d   : > { %1322 = vmatprep.mubr.bf16.mxu0 %v852_v0 }
 0x15f   : > { %1309 = vmatpush1.bf16.msra.mxu0 %v2114_v63  ;;  %1538 = vxpose.xlu0.b32.cont [12/16] (narrow) %v1522_v36, 8  ;;  %v1891_v63 = vld [vmem:[%s505_s25] ss:$0 sm:$0xff] }
 0x160   : > { %1310 = vmatprep.subr.bf16.mxu0 %v2119_v1 }
 0x163   : > { %1311 = vmatpush1.bf16.msra.mxu0 %v2117_v2  ;;  %1539 = vxpose.xlu0.b32.cont [13/16] (narrow) %v1523_v37, 8 }
 0x164   : > { %1312 = vmatprep.subr.bf16.mxu0 %v2122_v3 }
 0x167   : > { %1313 = vmatpush1.bf16.msra.mxu0 %v2120_v4  ;;  %1540 = vxpose.xlu0.b32.cont [14/16] (narrow) %v1524_v38, 8 }
 0x168   : > { %1314 = vmatprep.subr.bf16.mxu0 %v2125_v5 }
 0x16b   : > { %1315 = vmatpush1.bf16.msra.mxu0 %v2123_v6  ;;  %1541 = vxpose.xlu0.b32.cont [15/16] (narrow) %v1525_v39, 8 }
 0x16c   : > { %1316 = vmatprep.subr.bf16.mxu0 %v2128_v8 }
 0x16f   : > { %1317 = vmatpush1.bf16.msra.mxu0 %v2126_v9  ;;  %1542 = vxpose.xlu0.b32.end [16/16] (narrow) %v1526_v40, 8 }
 0x170   : > { %1318 = vmatprep.subr.bf16.mxu0 %v2131_v11 }
 0x173   : > { %1319 = vmatpush1.bf16.msra.mxu0 %v2129_v12 }
 0x174   : > { %1320 = vmatprep.subr.bf16.mxu0 %v2134_v14 }
 0x177   : > { %1321 = vmatpush1.bf16.msra.mxu0 %v2132_v15 }
 0x17a   : > { %1323 = vmatmul.mubr.bf16.vlgmr.msra.gmra.mrb[0].mxu0 %v851_v17 }
 0x1b3   : > { %v1543_v54 = vpop.trf.xlu0 }
 0x1b4   : > { %v1562_v59 = vrot.slane %v1543_v54, %v2504_v22 }
 0x24d   : > { %v1324_v44 = vpop.f32.mrb[0].mxu0 }
 0x24e   : > { %v1919_v45 = vadd.f32 %v1324_v44, %v922_v42  ;;  %v1326_v46 = vpop.f32.mrb[1].mxu0 }
 0x24f   : > { %v1920_v47 = vadd.f32 %v1326_v46, %v926_v43  ;;  %v1328_v48 = vpop.f32.mrb[2].mxu0 }
 0x250   : > { %v1331_v49 = vmax.f32 %v1919_v45, 0.0  ;;  %v1329_v50 = vpop.f32.mrb[3].mxu0 }
 0x251   : > { %v1332_v51 = vmax.f32 %v1920_v47, 0.0 }
 0x252   : > { %v1333_v53 = vpack.c.bf16 %v1331_v49, %v1331_v49 }
 0x253   : > { %v1334_v52 = vpack.c.bf16 %v1332_v51, %v1332_v51 }
 0x255   : > { %1502 = vmatprep.mubr.bf16.mxu1 %v1334_v52 }
 0x256   : > { %1503 = vmatmul.mubr.bf16.vlgmr.msra.gmra.mrb[8].mxu1 %v1333_v53 }
 0x329   : > { %v1913_v21 = vpop.f32.mrb[8].mxu1 }
 0x32a   : > { %v1914_v24 = vpop.f32.mrb[9].mxu1 }
 0x32b   : > { %v1915_v56 = vadd.f32 %v1914_v24, %v1913_v21  ;;  %v1916_v57 = vpop.f32.mrb[10].mxu1 }
 0x32c   : > { %v1917_v58 = vpop.f32.mrb[11].mxu1 }
 0x32d   : > { %v1505_v60 = vadd.f32 %v1915_v56, %v1874_v55 }
 0x32f   : > { %v1510_v61 = vmax.f32 %v1505_v60, 0.0 }
 0x331   : > { %v1563_v62 = vmul.f32 %v1562_v59, %v1510_v61 }
 0x333   : > { %1564 = vadd.xlane.f32.xlu1 %v1563_v62 }
 0x3c0   : > { %v1565_v0 = vpop.xlane.xlu1 %1564 }
 0x3c1   : > { %v1573_v1 = vadd.f32 %v1891_v63, %v1565_v0 }
 0x3c3   : > { %1575 = vst.msk [vmem:[%s512_s15] sm:$0xff] %vm1574_vm1, %v1573_v1 }
 0x3c4 PF: > { %s22_s14 = sadd.s32 1, %s2231_s14   ;;  %s2627_s30 = smov %s2215_s10 }
 0x3c5   : > { %p19_p7 = scmp.ge.s32.totalorder %s22_s14, 4   ;;  %s2628_s10 = smov %s2219_s11 }
 0x3c6   : > { %s2629_s11 = smov %s2335_s21  ;;  %s2630_s12 = smov %s2227_s13 }
 0x3c7   : > { %s2631_s13 = smov %s2633_s16  ;;  %21 = sbr.rel (!%p19_p7) target bundleno = 4 (0x4), region = 120 }
 0x3ce   :  { %1601 = vsyncpa [#allocation3], 1 }
 0x3cf   :  { %1603 = vsyncpa [#allocation3 + $0x1], 1 }

</bundles_post_ra>
